<compile_context>
chip_gen: v7x
topology: tpu7x:2x2x1
jax: 0.10.0
libtpu: 0.0.40
codegen_flags: <defaults>
</compile_context>

<pallas_src>
import functools

import jax
import jax.numpy as jnp
from jax import lax
from jax.experimental import pallas as pl
from jax.experimental.pallas import tpu as pltpu

LN_EPS = 1e-5  # torch.nn.LayerNorm default


def _round_up(x, m):
    return ((x + m - 1) // m) * m


def _proto_kernel(x_ref, w1_ref, p_ref, w2_ref, o_ref):
    """Fused Linear -> LayerNorm -> ReLU -> Linear for one batch tile.

    x_ref : [tile_n, H] f32      w1_ref: [H, P] bf16
    p_ref : [4, P] f32 (rows: b1, gamma, beta, b2)
    w2_ref: [P, P] bf16          o_ref : [tile_n, P]
    """
    b1 = p_ref[0:1, :]
    gamma = p_ref[1:2, :]
    beta = p_ref[2:3, :]
    b2 = p_ref[3:4, :]

    # Linear 1 on the MXU: bf16 operands, f32 accumulation.
    x = x_ref[...].astype(jnp.bfloat16)
    h = jnp.dot(x, w1_ref[...], preferred_element_type=jnp.float32) + b1

    # LayerNorm over last dim (P), biased variance like torch.nn.LayerNorm.
    # Kept entirely in f32 on the VPU/EUP (v5e has no bf16 VPU path).
    mean = jnp.mean(h, axis=-1, keepdims=True)
    centered = h - mean
    var = jnp.mean(centered * centered, axis=-1, keepdims=True)
    h = centered * lax.rsqrt(var + LN_EPS)
    h = h * gamma + beta

    # ReLU
    h = jnp.maximum(h, 0.0)

    # TODO(synk): Dropout is identity in eval mode; training-mode dropout would
    # need pltpu.prng_seed / pltpu.stateful_bernoulli.

    # Linear 2 on the MXU: bf16 operands, f32 accumulation.
    out = jnp.dot(h.astype(jnp.bfloat16), w2_ref[...],
                  preferred_element_type=jnp.float32) + b2
    o_ref[...] = out.astype(o_ref.dtype)


def _choose_tile(n, tile_n):
    """Pick an MXU-friendly batch tile (multiple of 8) from the requested one."""
    t = min(tile_n, _round_up(n, 8))
    # v7x has 2 TensorCores: make sure the 'parallel' grid has >= 2 steps when
    # the batch is big enough to split.
    if n >= 16:
        t = min(t, _round_up(-(-n // 2), 8))
    return max(t, 8)


@functools.partial(jax.jit, static_argnames=("tile_n",))
def topic_prototype_forward(x, w1, b1, gamma, beta, w2, b2, *, tile_n=256):
    """x: [N, H] float32, returns [N, P] (same dtype as x)."""
    N, H = x.shape
    P = w1.shape[1]

    tile = _choose_tile(N, tile_n)
    n_pad = _round_up(N, tile)
    x_p = x if n_pad == N else jnp.pad(x, ((0, n_pad - N), (0, 0)))
    grid = (n_pad // tile,)

    # Weights fed to the MXU as bf16 (f32 accumulation inside the kernel).
    w1_b = w1.astype(jnp.bfloat16)
    w2_b = w2.astype(jnp.bfloat16)
    # Pack the four [P] vectors into one [4, P] block -> single small DMA.
    params = jnp.stack([b1, gamma, beta, b2], axis=0).astype(jnp.float32)

    # Constant-index operands; Pallas skips redundant re-fetches across grid
    # steps since their block index never changes (VMEM is a non-issue at P=128).
    const = lambda shape: pl.BlockSpec(shape, lambda i: (0, 0))

    cost = pl.CostEstimate(
        flops=2 * n_pad * (H * P + P * P),
        transcendentals=n_pad,  # one rsqrt per row
        bytes_accessed=(4 * n_pad * H + 4 * n_pad * P
                        + 2 * (H * P + P * P) + 4 * 4 * P),
    )

    out = pl.pallas_call(
        _proto_kernel,
        out_shape=jax.ShapeDtypeStruct((n_pad, P), x.dtype),
        grid_spec=pltpu.PrefetchScalarGridSpec(
            num_scalar_prefetch=0,
            grid=grid,
            in_specs=[
                pl.BlockSpec((tile, H), lambda i: (i, 0)),  # x tile
                const((H, P)),                              # w1 (bf16)
                const((4, P)),                              # packed b1/gamma/beta/b2
                const((P, P)),                              # w2 (bf16)
            ],
            out_specs=pl.BlockSpec((tile, P), lambda i: (i, 0)),
        ),
        compiler_params=pltpu.CompilerParams(
            dimension_semantics=("parallel",)),
        cost_estimate=cost,
    )(x_p, w1_b, params, w2_b)

    return out if n_pad == N else out[:N]


def _reference_forward(x, w1, b1, gamma, beta, w2, b2):
    h = x @ w1 + b1
    mean = h.mean(-1, keepdims=True)
    var = ((h - mean) ** 2).mean(-1, keepdims=True)
    h = (h - mean) / jnp.sqrt(var + LN_EPS)
    h = h * gamma + beta
    h = jnp.maximum(h, 0.0)
    return h @ w2 + b2


if __name__ == "__main__":
    # Module-consistent shapes: topic_hidden_size H = 32, prototype_dim P = 128.
    H, P = 32, 128

    key = jax.random.PRNGKey(0)
    kx, k1, k2, k3, k4, kx2 = jax.random.split(key, 6)

    # Deterministic synthetic parameters (shapes from the module __init__).
    w1 = jax.random.normal(k1, (H, P), dtype=jnp.float32) * (1.0 / jnp.sqrt(H))
    b1 = jax.random.normal(k2, (P,), dtype=jnp.float32) * 0.01
    gamma = jnp.ones((P,), dtype=jnp.float32)
    beta = jnp.zeros((P,), dtype=jnp.float32)
    w2 = jax.random.normal(k3, (P, P), dtype=jnp.float32) * (1.0 / jnp.sqrt(P))
    b2 = jax.random.normal(k4, (P,), dtype=jnp.float32) * 0.01
    # temperature parameter exists on the module but is unused in forward().

    # Case 1: small batch (N = 8).
    x = jax.random.normal(kx, (8, H), dtype=jnp.float32)
    out = jax.block_until_ready(topic_prototype_forward(x, w1, b1, gamma, beta, w2, b2))
    ref = _reference_forward(x, w1, b1, gamma, beta, w2, b2)
    assert out.shape == (8, P)
    assert jnp.allclose(out, ref, atol=5e-2, rtol=5e-2), "mismatch vs reference (N=8)"

    # Case 2: ragged batch (N = 300) -> exercises padding + multi-step grid.
    x2 = jax.random.normal(kx2, (300, H), dtype=jnp.float32)
    out2 = jax.block_until_ready(topic_prototype_forward(x2, w1, b1, gamma, beta, w2, b2))
    ref2 = _reference_forward(x2, w1, b1, gamma, beta, w2, b2)
    assert out2.shape == (300, P)
    assert jnp.allclose(out2, ref2, atol=5e-2, rtol=5e-2), "mismatch vs reference (N=300)"

    print("KERNEL_OK")
</pallas_src>

<mosaic_0001>
module attributes {stable_mosaic.version = 11 : i64} {
  func.func @_proto_kernel(%arg0: i32, %arg1: memref<8x32xf32, #tpu.memory_space<vmem>>, %arg2: memref<32x128xbf16, #tpu.memory_space<vmem>>, %arg3: memref<4x128xf32, #tpu.memory_space<vmem>>, %arg4: memref<128x128xbf16, #tpu.memory_space<vmem>>, %arg5: memref<8x128xf32, #tpu.memory_space<vmem>>) attributes {dimension_semantics = [#tpu.dimension_semantics<parallel>], iteration_bounds = array<i64: 1>, scalar_prefetch = 0 : i64, scratch_operands = 0 : i64, tpu.core_type = #tpu.core_type<tc>, window_params = [{transform_indices = @transform_0, window_bounds = array<i64: 8, 32>}, {pipeline_mode = #tpu.pipeline_mode<synchronous>, transform_indices = @transform_1, window_bounds = array<i64: 32, 128>}, {pipeline_mode = #tpu.pipeline_mode<synchronous>, transform_indices = @transform_2, window_bounds = array<i64: 4, 128>}, {pipeline_mode = #tpu.pipeline_mode<synchronous>, transform_indices = @transform_3, window_bounds = array<i64: 128, 128>}, {transform_indices = @transform_4, window_bounds = array<i64: 8, 128>}]} {
    %c0 = arith.constant 0 : index
    %c0_0 = arith.constant 0 : index
    %0 = vector.load %arg3[%c0, %c0_0] : memref<4x128xf32, #tpu.memory_space<vmem>>, vector<1x128xf32>
    %c1 = arith.constant 1 : index
    %c0_1 = arith.constant 0 : index
    %1 = vector.load %arg3[%c1, %c0_1] : memref<4x128xf32, #tpu.memory_space<vmem>>, vector<1x128xf32>
    %c2 = arith.constant 2 : index
    %c0_2 = arith.constant 0 : index
    %2 = vector.load %arg3[%c2, %c0_2] : memref<4x128xf32, #tpu.memory_space<vmem>>, vector<1x128xf32>
    %c3 = arith.constant 3 : index
    %c0_3 = arith.constant 0 : index
    %3 = vector.load %arg3[%c3, %c0_3] : memref<4x128xf32, #tpu.memory_space<vmem>>, vector<1x128xf32>
    %c0_4 = arith.constant 0 : index
    %c0_5 = arith.constant 0 : index
    %4 = vector.load %arg1[%c0_4, %c0_5] : memref<8x32xf32, #tpu.memory_space<vmem>>, vector<8x32xf32>
    %5 = arith.truncf %4 : vector<8x32xf32> to vector<8x32xbf16>
    %c0_6 = arith.constant 0 : index
    %c0_7 = arith.constant 0 : index
    %6 = vector.load %arg2[%c0_6, %c0_7] : memref<32x128xbf16, #tpu.memory_space<vmem>>, vector<32x128xbf16>
    %cst = arith.constant dense<0.000000e+00> : vector<8x128xf32>
    %7 = tpu.matmul %5, %6, %cst {dimension_numbers = #tpu.dot_dimension_numbers<[1], [0], [0], [1], [0, 0, 1, 1], [], []>} : vector<8x32xbf16>, vector<32x128xbf16>, vector<8x128xf32> -> vector<8x128xf32>
    %8 = vector.broadcast %0 : vector<1x128xf32> to vector<8x128xf32>
    %9 = arith.addf %7, %8 : vector<8x128xf32>
    %cst_8 = arith.constant dense<0.000000e+00> : vector<8xf32>
    %10 = vector.multi_reduction <add>, %9, %cst_8 [1] : vector<8x128xf32> to vector<8xf32>
    %11 = vector.shape_cast %10 : vector<8xf32> to vector<8x1xf32>
    %cst_9 = arith.constant 1.280000e+02 : f32
    %12 = vector.broadcast %cst_9 : f32 to vector<8x1xf32>
    %13 = arith.divf %11, %12 : vector<8x1xf32>
    %14 = vector.broadcast %13 : vector<8x1xf32> to vector<8x128xf32>
    %15 = arith.subf %9, %14 : vector<8x128xf32>
    %16 = arith.mulf %15, %15 : vector<8x128xf32>
    %cst_10 = arith.constant dense<0.000000e+00> : vector<8xf32>
    %17 = vector.multi_reduction <add>, %16, %cst_10 [1] : vector<8x128xf32> to vector<8xf32>
    %18 = vector.shape_cast %17 : vector<8xf32> to vector<8x1xf32>
    %cst_11 = arith.constant 1.280000e+02 : f32
    %19 = vector.broadcast %cst_11 : f32 to vector<8x1xf32>
    %20 = arith.divf %18, %19 : vector<8x1xf32>
    %cst_12 = arith.constant 9.99999974E-6 : f32
    %21 = vector.broadcast %cst_12 : f32 to vector<8x1xf32>
    %22 = arith.addf %20, %21 : vector<8x1xf32>
    %23 = math.rsqrt %22 : vector<8x1xf32>
    %24 = vector.broadcast %23 : vector<8x1xf32> to vector<8x128xf32>
    %25 = arith.mulf %15, %24 : vector<8x128xf32>
    %26 = vector.broadcast %1 : vector<1x128xf32> to vector<8x128xf32>
    %27 = arith.mulf %25, %26 : vector<8x128xf32>
    %28 = vector.broadcast %2 : vector<1x128xf32> to vector<8x128xf32>
    %29 = arith.addf %27, %28 : vector<8x128xf32>
    %cst_13 = arith.constant 0.000000e+00 : f32
    %30 = vector.broadcast %cst_13 : f32 to vector<8x128xf32>
    %31 = arith.maximumf %29, %30 : vector<8x128xf32>
    %32 = arith.truncf %31 : vector<8x128xf32> to vector<8x128xbf16>
    %c0_14 = arith.constant 0 : index
    %c0_15 = arith.constant 0 : index
    %33 = vector.load %arg4[%c0_14, %c0_15] : memref<128x128xbf16, #tpu.memory_space<vmem>>, vector<128x128xbf16>
    %cst_16 = arith.constant dense<0.000000e+00> : vector<8x128xf32>
    %34 = tpu.matmul %32, %33, %cst_16 {dimension_numbers = #tpu.dot_dimension_numbers<[1], [0], [0], [1], [0, 0, 1, 1], [], []>} : vector<8x128xbf16>, vector<128x128xbf16>, vector<8x128xf32> -> vector<8x128xf32>
    %35 = vector.broadcast %3 : vector<1x128xf32> to vector<8x128xf32>
    %36 = arith.addf %34, %35 : vector<8x128xf32>
    %c0_17 = arith.constant 0 : index
    %c0_18 = arith.constant 0 : index
    %37 = vector.load %arg5[%c0_17, %c0_18] : memref<8x128xf32, #tpu.memory_space<vmem>>, vector<8x128xf32>
    tpu.vector_store %arg5[%c0_17, %c0_18], %36 {strides = array<i32>} : memref<8x128xf32, #tpu.memory_space<vmem>>, vector<8x128xf32>,
    return
  }
  func.func @transform_0(%arg0: i32) -> (i32, i32) {
    %c0_i32 = arith.constant 0 : i32
    %c0_i32_0 = arith.constant 0 : i32
    return %arg0, %c0_i32 : i32, i32
  }
  func.func @transform_1(%arg0: i32) -> (i32, i32) {
    %c0_i32 = arith.constant 0 : i32
    %c0_i32_0 = arith.constant 0 : i32
    %c0_i32_1 = arith.constant 0 : i32
    return %c0_i32, %c0_i32_0 : i32, i32
  }
  func.func @transform_2(%arg0: i32) -> (i32, i32) {
    %c0_i32 = arith.constant 0 : i32
    %c0_i32_0 = arith.constant 0 : i32
    %c0_i32_1 = arith.constant 0 : i32
    return %c0_i32, %c0_i32_0 : i32, i32
  }
  func.func @transform_3(%arg0: i32) -> (i32, i32) {
    %c0_i32 = arith.constant 0 : i32
    %c0_i32_0 = arith.constant 0 : i32
    %c0_i32_1 = arith.constant 0 : i32
    return %c0_i32, %c0_i32_0 : i32, i32
  }
  func.func @transform_4(%arg0: i32) -> (i32, i32) {
    %c0_i32 = arith.constant 0 : i32
    %c0_i32_0 = arith.constant 0 : i32
    return %arg0, %c0_i32 : i32, i32
  }
}

</mosaic_0001>

<bundles_post_ra>
// kernel: topic_prototype_forward.1
= control target key start
LH: loop header
LB: loop body
LE: loop exit
PB: predicated region body
PF: predicated region fallthrough
CT: control target
= control target key end

     0   :  { %v330_v1 = vmov 0.0   ;;  %vm331_vm0 = vmmov 0   ;;  %vm45_vm1 = vcmask 261120   ;;  %s415_s0 = inlined_call_operand.vmem [shape: f32[8,32], index: 0, kind: input, shape index: {}]   ;;  %s416_s1 = inlined_call_operand.vmem [shape: bf16[32,128], index: 1, kind: input, shape index: {}]   ;;  %s417_s2 = inlined_call_operand.vmem [shape: f32[4,128], index: 2, kind: input, shape index: {}]   ;;  %s418_s3 = inlined_call_operand.vmem [shape: bf16[128,128], index: 3, kind: input, shape index: {}]   ;;  %s419_s4 = inlined_call_operand.hbm [shape: f32[8,128], index: 4, kind: output, shape index: {}]  }
   0x1   :  { %v294_v0 = vld [vmem:[%s416_s1] sm:$0xff]   ;;  %263 = vmatprep.subr.bf16.mxu0 %v330_v1  ;;  %271 = vmatprep.subr.bf16.mxu1 %v330_v1  ;;  %v295_v2 = vld [vmem:[%s416_s1 + $0x8] sm:$0xff]  }
   0x2   :  { %264 = vmatpush3.bf16.msra.mxu0 %v294_v0  ;;  %267 = vmatprep.mubr.msk.bf16.mxu0 %vm331_vm0, %v330_v1  ;;  %v23_v3 = vld [vmem:[%s415_s0] sm:$0xff] }
   0x3   :  { %265 = vmatprep.subr.bf16.mxu0 %v330_v1  ;;  %287 = vmatprep.mubr.msk.bf16.mxu1 %vm331_vm0, %v330_v1  ;;  %v24_v4 = vpack.c.bf16 %v23_v3, %v23_v3 }
   0x6   :  { %266 = vmatpush3.bf16.msra.mxu0 %v295_v2 }
   0x7   :  { %9 = vsyncpa [#allocation3], 0  ;;  %v236_v5 = vld [vmem:[%s417_s2] ss:$0 sm:$0xff]  ;;  %v297_v12 = vld [vmem:[%s418_s3 + $0x8] sm:$0xff]   ;;  %s332_s16 = smov [#allocation2]  }
   0x8   :  { %v296_v11 = vld [vmem:[%s418_s3] sm:$0xff]   ;;  %v298_v17 = vld [vmem:[%s418_s3 + $0x10] sm:$0xff]   ;;  %v299_v18 = vld [vmem:[%s418_s3 + $0x18] sm:$0xff]   ;;  %s228_s17 = sshll.u32 %s332_s16, 4  ;;  %s229_s17 = int_to_ptr.vmem [resolvable:$true] %s228_s17 }
   0x9   :  { %268 = vmatmul.mubr.msk.bf16.vlgmr.msra.gmra.mrb[0].mxu0 %vm45_vm1, %v24_v4  ;;  %272 = vmatpush3.bf16.msra.mxu1 %v296_v11  ;;  %v300_v19 = vld [vmem:[%s418_s3 + $0x20] sm:$0xff]   ;;  %v301_v20 = vld [vmem:[%s418_s3 + $0x28] sm:$0xff]   ;;  %v302_v21 = vld [vmem:[%s418_s3 + $0x30] sm:$0xff]   ;;  %s306_s18 = scalar_lea.vmem %s229_s17, 128  ;;  %p311_p1 = scmp.lt.s32.totalorder %s229_s17, %s229_s17 }
   0xa   :  { %273 = vmatprep.subr.bf16.mxu1 %v330_v1  ;;  %v303_v22 = vld [vmem:[%s418_s3 + $0x38] sm:$0xff]   ;;  %v240_v27 = vld [vmem:[%s417_s2 + $0x1] ss:$0 sm:$0xff]  ;;  %v241_v29 = vld [vmem:[%s417_s2 + $0x2] ss:$0 sm:$0xff]  ;;  %p307_p0 = scmp.ne.s32.totalorder %s229_s17, %s306_s18  ;;  %p312_p2 = scmp.lt.s32.totalorder %s306_s18, %s306_s18 }
   0xb   :  { %v242_v34 = vld [vmem:[%s417_s2 + $0x3] ss:$0 sm:$0xff] }
   0xc   :  { %p313_p3 = por %p312_p2, %p311_p1 }
   0xd   :  { %274 = vmatpush3.bf16.msra.mxu1 %v297_v12 }
   0xe   :  { %275 = vmatprep.subr.bf16.mxu1 %v330_v1  ;;  %p314_p4 = pnand %p313_p3, %p307_p0 }
  0x11   :  { %276 = vmatpush3.bf16.msra.mxu1 %v298_v17 }
  0x12   :  { %277 = vmatprep.subr.bf16.mxu1 %v330_v1 }
  0x15   :  { %278 = vmatpush3.bf16.msra.mxu1 %v299_v18 }
  0x16   :  { %279 = vmatprep.subr.bf16.mxu1 %v330_v1 }
  0x19   :  { %280 = vmatpush3.bf16.msra.mxu1 %v300_v19 }
  0x1a   :  { %281 = vmatprep.subr.bf16.mxu1 %v330_v1 }
  0x1d   :  { %282 = vmatpush3.bf16.msra.mxu1 %v301_v20 }
  0x1e   :  { %283 = vmatprep.subr.bf16.mxu1 %v330_v1 }
  0x21   :  { %284 = vmatpush3.bf16.msra.mxu1 %v302_v21 }
  0x22   :  { %285 = vmatprep.subr.bf16.mxu1 %v330_v1 }
  0x25   :  { %286 = vmatpush3.bf16.msra.mxu1 %v303_v22 }
  0xdc   :  { %v83_v6 = vpop.f32.mrb[0].mxu0 }
  0xdd   :  { %v84_v7 = vadd.f32 %v236_v5, %v83_v6  ;;  %v269_v8 = vpop.f32.mrb[1].mxu0 }
  0xde   :  { %v86_v9 = vpop.f32.mrb[2].mxu0 }
  0xdf   :  { %v270_v10 = vpop.f32.mrb[3].mxu0  ;;  %89 = vadd.xlane.f32.xlu0 %v84_v7 }
 0x16c   :  { %v90_v13 = vpop.xlane.xlu0 %89 }
 0x16d   :  { %v92_v14 = vmul.f32 0.0078125, %v90_v13 }
 0x16f   :  { %v93_v15 = vsub.f32 %v84_v7, %v92_v14 }
 0x171   :  { %v94_v16 = vmul.f32 %v93_v15, %v93_v15 }
 0x173   :  { %95 = vadd.xlane.f32.xlu0 %v94_v16 }
 0x200   :  { %v96_v23 = vpop.xlane.xlu0 %95 }
 0x201   :  { %v97_v24 = vmul.f32 0.0078125, %v96_v23 }
 0x203   :  { %v98_v25 = vadd.f32 1e-05, %v97_v24 }
 0x205   :  { %304 = vrsqrt.f32 %v98_v25 }
 0x20f   :  { %v305_v26 = vpop.eup %304 }
 0x210   :  { %v100_v28 = vmul.f32 %v305_v26, %v93_v15 }
 0x212   :  { %v105_v30 = vmul.f32 %v240_v27, %v100_v28 }
 0x214   :  { %v110_v31 = vadd.f32 %v241_v29, %v105_v30 }
 0x216   :  { %v111_v32 = vmax.f32 %v110_v31, 0.0 }
 0x218   :  { %v112_v33 = vpack.c.bf16 %v111_v32, %v111_v32 }
 0x21a   :  { %288 = vmatmul.mubr.bf16.vlgmr.msra.gmra.mrb[0].mxu1 %v112_v33 }
 0x2ed   :  { %v215_v35 = vpop.f32.mrb[0].mxu1 }
 0x2ee   :  { %v216_v36 = vadd.f32 %v242_v34, %v215_v35  ;;  %v289_v37 = vpop.f32.mrb[1].mxu1 }
 0x2ef   :  { %v218_v38 = vpop.f32.mrb[2].mxu1 }
 0x2f0   :  { %221 = vst [vmem:[#allocation2] sm:$0xff] %v216_v36  ;;  %v290_v39 = vpop.f32.mrb[3].mxu1 }
 0x2f1   :  { %317 = shalt.err (!%p314_p4)
}
 0x2f2   :  { %s318_s2 = scalar_lea.hbm %s419_s4, 128 }
 0x2f3   :  { %p319_p5 = scmp.ne.s32.totalorder %s419_s4, %s318_s2  ;;  %p322_p6 = scmp.lt.u32.totalorder %s318_s2, %s419_s4 }
 0x2f5   :  { %p324_p7 = pnand %p322_p6, %p319_p5 }
 0x2f7   :  { %327 = shalt.err (!%p324_p7)
}
 0x2f8   :  { %231 = dma.vmem_to_hbm [thread:$0]  %s229_s17, 128, %s419_s4, [#allocation3]  }
 0x2f9   :  { %328 = dma.done.wait [#allocation3], 128  }
 0x2fa   :  { %329 = vsyncadd [#allocation3], 4294967168 }
 0x2fb   :  { %235 = vsyncpa [#allocation3], 1 }

</bundles_post_ra>
